<compile_context>
chip_gen: v6e
topology: v6e:2x2x1
jax: 0.10.0
libtpu: 0.0.40
codegen_flags: <defaults>
</compile_context>

<pallas_src>
import math

import jax
import jax.numpy as jnp
from jax import lax
from jax.experimental import pallas as pl
from jax.experimental.pallas import tpu as pltpu

_EPS = 1e-12  # F.normalize default eps


def _cosine_kernel_train(sigma_ref, x_ref, w_ref, invx_ref, invw_ref,
                         wsigma_ref, wosigma_ref):
    # MXU matmul: contract dim 1 of x [tm, Din] with dim 1 of W [tn, Din]
    # -> [tm, tn] f32 accumulator, no explicit W transpose.
    acc = lax.dot_general(
        x_ref[...], w_ref[...],
        dimension_numbers=(((1,), (1,)), ((), ())),
        preferred_element_type=jnp.float32)
    out = acc * invx_ref[...] * invw_ref[...]          # [tm,1] and [1,tn] broadcast
    sigma = sigma_ref[0]                               # scalar from SMEM
    wosigma_ref[...] = out.astype(wosigma_ref.dtype)
    wsigma_ref[...] = (sigma * out).astype(wsigma_ref.dtype)


def _cosine_kernel_eval(sigma_ref, x_ref, w_ref, invx_ref, invw_ref, out_ref):
    acc = lax.dot_general(
        x_ref[...], w_ref[...],
        dimension_numbers=(((1,), (1,)), ((), ())),
        preferred_element_type=jnp.float32)
    out_ref[...] = (sigma_ref[0] * acc * invx_ref[...] * invw_ref[...]).astype(out_ref.dtype)


def _row_inv_norm(a):
    # 1 / max(||row||_2, eps) == rsqrt(max(sum(row^2), eps^2))
    af = a.astype(jnp.float32)
    sumsq = jnp.sum(af * af, axis=1, keepdims=True)
    return lax.rsqrt(jnp.maximum(sumsq, jnp.float32(_EPS * _EPS)))


def _pick_tile(dim, candidates):
    for c in candidates:
        if dim >= c and dim % c == 0:
            return c
    return dim  # fall back to full dim (always a legal block size)


def cosine_linear(x, weight, sigma, *, training=False):
    """x: [B, Din], weight: [Dout, Din], sigma: scalar / [1] array or None."""
    B, Din = x.shape
    Dout, Din_w = weight.shape
    assert Din == Din_w

    sigma_arr = (jnp.asarray(sigma, jnp.float32).reshape(1)
                 if sigma is not None else jnp.ones((1,), jnp.float32))

    # Tiny per-row inverse norms, precomputed once (W's norms are batch-invariant,
    # so the kernel inner loop is pure MXU + an O(tm*tn) output scale).
    inv_x = _row_inv_norm(x)                          # [B, 1]    f32
    inv_w = _row_inv_norm(weight).reshape(1, Dout)    # [1, Dout] f32

    # Tile sizes: prefer 256-multiples for the v6e/v7x 2x256^2 MXU, 128 for v5e;
    # fall back to full dims for small problems.
    tm = _pick_tile(B, (256, 128, 64, 32, 16, 8))
    tn = _pick_tile(Dout, (512, 256, 128))
    grid = (B // tm, Dout // tn)
    # TODO(synk): add a K grid axis + f32 VMEM accumulator scratch (pl.when
    # init/finalize) if Din ever becomes too large for a (tile, Din) VMEM slab.

    n_out = 2 if training else 1
    itemsize = jnp.dtype(x.dtype).itemsize
    vmem_need = (2 * (tm * Din + tn * Din) * itemsize   # double-buffered x / W tiles
                 + 2 * (tm + tn) * 4                    # inv-norm vectors
                 + 2 * n_out * tm * tn * itemsize)      # double-buffered outputs
    vmem_limit = int(min(max(2 * vmem_need, 16 * 2 ** 20), 64 * 2 ** 20))

    in_specs = [
        pl.BlockSpec(memory_space=pltpu.SMEM),          # sigma scalar
        pl.BlockSpec((tm, Din), lambda i, j: (i, 0)),   # x tile
        pl.BlockSpec((tn, Din), lambda i, j: (j, 0)),   # W tile (row-major)
        pl.BlockSpec((tm, 1), lambda i, j: (i, 0)),     # inv_x tile
        pl.BlockSpec((1, tn), lambda i, j: (0, j)),     # inv_w tile
    ]
    out_block = pl.BlockSpec((tm, tn), lambda i, j: (i, j))
    compiler_params = pltpu.CompilerParams(
        dimension_semantics=("parallel", "parallel"),   # both axes independent
        vmem_limit_bytes=vmem_limit,
    )

    if training:
        wsigma, wosigma = pl.pallas_call(
            _cosine_kernel_train,
            grid=grid,
            out_shape=(jax.ShapeDtypeStruct((B, Dout), x.dtype),
                       jax.ShapeDtypeStruct((B, Dout), x.dtype)),
            in_specs=in_specs,
            out_specs=(out_block, out_block),
            compiler_params=compiler_params,
        )(sigma_arr, x, weight, inv_x, inv_w)
        if sigma is None:
            wsigma = wosigma                            # out_s = out when sigma absent
        return {"wsigma": wsigma, "wosigma": wosigma}

    # Eval: only the sigma-scaled logits are needed -> single output.
    out = pl.pallas_call(
        _cosine_kernel_eval,
        grid=grid,
        out_shape=jax.ShapeDtypeStruct((B, Dout), x.dtype),
        in_specs=in_specs,
        out_specs=out_block,
        compiler_params=compiler_params,
    )(sigma_arr, x, weight, inv_x, inv_w)
    return out


def init_cosine_linear_params(key, in_features, out_features, sigma=True):
    # Mirrors reset_parameters(): weight ~ U(-stdv, stdv), stdv = 1/sqrt(in); sigma = 1.
    stdv = 1.0 / math.sqrt(in_features)
    weight = jax.random.uniform(
        key, (out_features, in_features), jnp.float32, minval=-stdv, maxval=stdv)
    sigma_p = jnp.ones((1,), jnp.float32) if sigma else None
    return weight, sigma_p


def _reference_cosine(x, w):
    xn = x / jnp.maximum(jnp.linalg.norm(x, axis=1, keepdims=True), _EPS)
    wn = w / jnp.maximum(jnp.linalg.norm(w, axis=1, keepdims=True), _EPS)
    return jnp.dot(xn, wn.T, precision=lax.Precision.HIGHEST)


if __name__ == "__main__":
    key = jax.random.PRNGKey(0)
    k1, k2, k3, k4 = jax.random.split(key, 4)

    # --- small case (single grid point, full-array blocks), eval + training ---
    B, Din, Dout = 8, 64, 128
    weight, sigma = init_cosine_linear_params(k1, Din, Dout, sigma=True)
    x = jax.random.normal(k2, (B, Din), jnp.float32)

    out_eval = cosine_linear(x, weight, sigma, training=False)
    out_train = cosine_linear(x, weight, sigma, training=True)
    jax.block_until_ready(out_eval)
    jax.block_until_ready(out_train["wsigma"])
    jax.block_until_ready(out_train["wosigma"])

    ref = _reference_cosine(x, weight)
    assert jnp.allclose(out_eval, sigma[0] * ref, atol=2e-4, rtol=2e-4)
    assert jnp.allclose(out_train["wosigma"], ref, atol=2e-4, rtol=2e-4)
    assert jnp.allclose(out_train["wsigma"], sigma[0] * ref, atol=2e-4, rtol=2e-4)

    # --- larger tiled case: grid = (2, 2), sigma != 1, eval mode ---
    B2, Din2, Dout2 = 512, 256, 1024
    w2, _ = init_cosine_linear_params(k3, Din2, Dout2, sigma=True)
    s2 = jnp.full((1,), 3.0, jnp.float32)
    x2 = jax.random.normal(k4, (B2, Din2), jnp.float32)
    out2 = cosine_linear(x2, w2, s2, training=False)
    jax.block_until_ready(out2)
    ref2 = _reference_cosine(x2, w2)
    assert jnp.allclose(out2, 3.0 * ref2, atol=2e-4, rtol=2e-4)

    # --- sigma=None path (training dict, both entries equal the raw cosine) ---
    out_ns = cosine_linear(x, weight, None, training=True)
    jax.block_until_ready(out_ns["wsigma"])
    assert jnp.allclose(out_ns["wsigma"], ref, atol=2e-4, rtol=2e-4)
    assert jnp.allclose(out_ns["wosigma"], ref, atol=2e-4, rtol=2e-4)

    print("KERNEL_OK")
</pallas_src>

<mosaic_0001>
module attributes {stable_mosaic.version = 11 : i64} {
  func.func @_cosine_kernel_eval(%arg0: i32, %arg1: i32, %arg2: memref<1xf32, #tpu.memory_space<smem>>, %arg3: memref<8x64xf32, #tpu.memory_space<vmem>>, %arg4: memref<128x64xf32, #tpu.memory_space<vmem>>, %arg5: memref<8x1xf32, #tpu.memory_space<vmem>>, %arg6: memref<1x128xf32, #tpu.memory_space<vmem>>, %arg7: memref<8x128xf32, #tpu.memory_space<vmem>>) attributes {dimension_semantics = [#tpu.dimension_semantics<parallel>, #tpu.dimension_semantics<parallel>], iteration_bounds = array<i64: 1, 1>, scalar_prefetch = 0 : i64, scratch_operands = 0 : i64, tpu.core_type = #tpu.core_type<tc>, window_params = [{transform_indices = @transform_0, window_bounds = array<i64: 1>}, {transform_indices = @transform_1, window_bounds = array<i64: 8, 64>}, {transform_indices = @transform_2, window_bounds = array<i64: 128, 64>}, {transform_indices = @transform_3, window_bounds = array<i64: 8, 1>}, {transform_indices = @transform_4, window_bounds = array<i64: 1, 128>}, {transform_indices = @transform_5, window_bounds = array<i64: 8, 128>}]} {
    %c0 = arith.constant 0 : index
    %c0_0 = arith.constant 0 : index
    %0 = vector.load %arg3[%c0, %c0_0] : memref<8x64xf32, #tpu.memory_space<vmem>>, vector<8x64xf32>
    %c0_1 = arith.constant 0 : index
    %c0_2 = arith.constant 0 : index
    %1 = vector.load %arg4[%c0_1, %c0_2] : memref<128x64xf32, #tpu.memory_space<vmem>>, vector<128x64xf32>
    %cst = arith.constant dense<0.000000e+00> : vector<8x128xf32>
    %2 = tpu.matmul %0, %1, %cst {dimension_numbers = #tpu.dot_dimension_numbers<[1], [1], [0], [0], [0, 0, 1, 0], [], []>} : vector<8x64xf32>, vector<128x64xf32>, vector<8x128xf32> -> vector<8x128xf32>
    %c0_3 = arith.constant 0 : index
    %3 = memref.load %arg2[%c0_3] : memref<1xf32, #tpu.memory_space<smem>>
    %4 = vector.broadcast %3 : f32 to vector<8x128xf32>
    %5 = arith.mulf %4, %2 : vector<8x128xf32>
    %c0_4 = arith.constant 0 : index
    %c0_5 = arith.constant 0 : index
    %6 = vector.load %arg5[%c0_4, %c0_5] : memref<8x1xf32, #tpu.memory_space<vmem>>, vector<8x1xf32>
    %7 = vector.broadcast %6 : vector<8x1xf32> to vector<8x128xf32>
    %8 = arith.mulf %5, %7 : vector<8x128xf32>
    %c0_6 = arith.constant 0 : index
    %c0_7 = arith.constant 0 : index
    %9 = vector.load %arg6[%c0_6, %c0_7] : memref<1x128xf32, #tpu.memory_space<vmem>>, vector<1x128xf32>
    %10 = vector.broadcast %9 : vector<1x128xf32> to vector<8x128xf32>
    %11 = arith.mulf %8, %10 : vector<8x128xf32>
    %c0_8 = arith.constant 0 : index
    %c0_9 = arith.constant 0 : index
    %12 = vector.load %arg7[%c0_8, %c0_9] : memref<8x128xf32, #tpu.memory_space<vmem>>, vector<8x128xf32>
    tpu.vector_store %arg7[%c0_8, %c0_9], %11 {strides = array<i32>} : memref<8x128xf32, #tpu.memory_space<vmem>>, vector<8x128xf32>,
    return
  }
  func.func @transform_0(%arg0: i32, %arg1: i32) -> i32 {
    %c0_i32 = arith.constant 0 : i32
    %c0_i32_0 = arith.constant 0 : i32
    return %c0_i32 : i32
  }
  func.func @transform_1(%arg0: i32, %arg1: i32) -> (i32, i32) {
    %c0_i32 = arith.constant 0 : i32
    %c0_i32_0 = arith.constant 0 : i32
    return %arg0, %c0_i32 : i32, i32
  }
  func.func @transform_2(%arg0: i32, %arg1: i32) -> (i32, i32) {
    %c0_i32 = arith.constant 0 : i32
    %c0_i32_0 = arith.constant 0 : i32
    return %arg1, %c0_i32 : i32, i32
  }
  func.func @transform_3(%arg0: i32, %arg1: i32) -> (i32, i32) {
    %c0_i32 = arith.constant 0 : i32
    %c0_i32_0 = arith.constant 0 : i32
    return %arg0, %c0_i32 : i32, i32
  }
  func.func @transform_4(%arg0: i32, %arg1: i32) -> (i32, i32) {
    %c0_i32 = arith.constant 0 : i32
    %c0_i32_0 = arith.constant 0 : i32
    return %c0_i32, %arg1 : i32, i32
  }
  func.func @transform_5(%arg0: i32, %arg1: i32) -> (i32, i32) {
    %c0_i32 = arith.constant 0 : i32
    return %arg0, %arg1 : i32, i32
  }
}

</mosaic_0001>

<bundles_post_ra>
// kernel: tpu_custom_call.1
= control target key start
LH: loop header
LB: loop body
LE: loop exit
PB: predicated region body
PF: predicated region fallthrough
CT: control target
= control target key end

     0   :  { %vm39_vm0 = vcmask 523264   ;;  %v291_v1 = vmov 0.0   ;;  %vm292_vm1 = vmmov 0   ;;  %v293_v2 = vmov 0   ;;  %s405_s0 = inlined_call_operand.<no memory space> [shape: f32[1], index: 0, kind: input, shape index: {}]   ;;  %s406_s1 = inlined_call_operand.vmem [shape: f32[8,64], index: 1, kind: input, shape index: {}]   ;;  %s407_s2 = inlined_call_operand.vmem [shape: f32[128,64], index: 2, kind: input, shape index: {}]   ;;  %s408_s3 = inlined_call_operand.vmem [shape: f32[8,1], index: 3, kind: input, shape index: {}]   ;;  %s409_s4 = inlined_call_operand.vmem [shape: f32[1,128], index: 4, kind: input, shape index: {}]   ;;  %s410_s5 = inlined_call_operand.hbm [shape: f32[8,128], index: 5, kind: output, shape index: {}]  }
   0x1   :  { %v38_v0 = vld [vmem:[%s407_s2 + $0x78] sm:$0xff]  ;;  %229 = vmatprep.subr.mxu0 %v291_v1  ;;  %261 = vmatprep.mubr.msk.f32.mxu0 %vm292_vm1, %v291_v1  ;;  %v37_v3 = vld [vmem:[%s407_s2 + $0x70] sm:$0xff]  ;;  %v164_v4 = vld [vmem:[%s408_s3] sm:$0xff] }
   0x2   :  { %230 = vmatpush3.xpose.msk.msra.mxu0 %vm39_vm0, %v38_v0  ;;  %268 = vset.pattern.permute.xlu0 %v293_v2 }
   0x3   :  { %231 = vmatprep.subr.mxu0 %v291_v1  ;;  %167 = vperm.xlu0 %268, %v164_v4  }
   0x6   :  { %232 = vmatpush3.xpose.msk.msra.mxu0 %vm39_vm0, %v37_v3 }
   0x7   :  { %11 = vsyncpa [#allocation4], 0  ;;  %233 = vmatprep.subr.mxu0 %v291_v1  ;;  %v36_v5 = vld [vmem:[%s407_s2 + $0x68] sm:$0xff]  ;;  %v35_v6 = vld [vmem:[%s407_s2 + $0x60] sm:$0xff]  ;;  %v162_v20 = vstv %s405_s0 }
   0x8   :  { %v34_v7 = vld [vmem:[%s407_s2 + $0x58] sm:$0xff]  ;;  %v33_v8 = vld [vmem:[%s407_s2 + $0x50] sm:$0xff]  ;;  %v32_v9 = vld [vmem:[%s407_s2 + $0x48] sm:$0xff] }
   0x9   :  { %v31_v10 = vld [vmem:[%s407_s2 + $0x40] sm:$0xff]  ;;  %v30_v11 = vld [vmem:[%s407_s2 + $0x38] sm:$0xff]  ;;  %v29_v12 = vld [vmem:[%s407_s2 + $0x30] sm:$0xff] }
   0xa   :  { %234 = vmatpush3.xpose.msk.msra.mxu0 %vm39_vm0, %v36_v5  ;;  %v28_v13 = vld [vmem:[%s407_s2 + $0x28] sm:$0xff]  ;;  %v27_v14 = vld [vmem:[%s407_s2 + $0x20] sm:$0xff]  ;;  %v26_v15 = vld [vmem:[%s407_s2 + $0x18] sm:$0xff] }
   0xb   :  { %235 = vmatprep.subr.mxu0 %v291_v1  ;;  %v25_v16 = vld [vmem:[%s407_s2 + $0x10] sm:$0xff]  ;;  %v24_v17 = vld [vmem:[%s407_s2 + $0x8] sm:$0xff]  ;;  %v23_v18 = vld [vmem:[%s407_s2] sm:$0xff]  ;;  %s294_s2 = smov [#allocation3]  }
   0xc   :  { %v22_v19 = vld [vmem:[%s406_s1] sm:$0xff]  ;;  %s186_s6 = sshll.u32 %s294_s2, 4  ;;  %s187_s6 = int_to_ptr.vmem [resolvable:$true] %s186_s6 }
   0xd   :  { %v211_v25 = vld [vmem:[%s409_s4] ss:$0 sm:$0xff]  ;;  %s269_s1 = scalar_lea.vmem %s187_s6, 128  ;;  %p274_p1 = scmp.lt.s32.totalorder %s187_s6, %s187_s6 }
   0xe   :  { %236 = vmatpush3.xpose.msk.msra.mxu0 %vm39_vm0, %v35_v6  ;;  %p270_p0 = scmp.ne.s32.totalorder %s187_s6, %s269_s1  ;;  %p275_p2 = scmp.lt.s32.totalorder %s269_s1, %s269_s1 }
   0xf   :  { %237 = vmatprep.subr.mxu0 %v291_v1 }
  0x10   :  { %p276_p3 = por %p275_p2, %p274_p1 }
  0x12   :  { %238 = vmatpush3.xpose.msk.msra.mxu0 %vm39_vm0, %v34_v7  ;;  %p277_p4 = pnand %p276_p3, %p270_p0 }
  0x13   :  { %239 = vmatprep.subr.mxu0 %v291_v1 }
  0x16   :  { %240 = vmatpush3.xpose.msk.msra.mxu0 %vm39_vm0, %v33_v8 }
  0x17   :  { %241 = vmatprep.subr.mxu0 %v291_v1 }
  0x1a   :  { %242 = vmatpush3.xpose.msk.msra.mxu0 %vm39_vm0, %v32_v9 }
  0x1b   :  { %243 = vmatprep.subr.mxu0 %v291_v1 }
  0x1e   :  { %244 = vmatpush3.xpose.msk.msra.mxu0 %vm39_vm0, %v31_v10 }
  0x1f   :  { %245 = vmatprep.subr.mxu0 %v291_v1 }
  0x22   :  { %246 = vmatpush3.xpose.msk.msra.mxu0 %vm39_vm0, %v30_v11 }
  0x23   :  { %247 = vmatprep.subr.mxu0 %v291_v1 }
  0x26   :  { %248 = vmatpush3.xpose.msk.msra.mxu0 %vm39_vm0, %v29_v12 }
  0x27   :  { %249 = vmatprep.subr.mxu0 %v291_v1 }
  0x2a   :  { %250 = vmatpush3.xpose.msk.msra.mxu0 %vm39_vm0, %v28_v13 }
  0x2b   :  { %251 = vmatprep.subr.mxu0 %v291_v1 }
  0x2e   :  { %252 = vmatpush3.xpose.msk.msra.mxu0 %vm39_vm0, %v27_v14 }
  0x2f   :  { %253 = vmatprep.subr.mxu0 %v291_v1 }
  0x32   :  { %254 = vmatpush3.xpose.msk.msra.mxu0 %vm39_vm0, %v26_v15 }
  0x33   :  { %255 = vmatprep.subr.mxu0 %v291_v1 }
  0x36   :  { %256 = vmatpush3.xpose.msk.msra.mxu0 %vm39_vm0, %v25_v16 }
  0x37   :  { %257 = vmatprep.subr.mxu0 %v291_v1 }
  0x3a   :  { %258 = vmatpush3.xpose.msk.msra.mxu0 %vm39_vm0, %v24_v17 }
  0x3b   :  { %259 = vmatprep.subr.mxu0 %v291_v1 }
  0x3e   :  { %260 = vmatpush3.xpose.msk.msra.mxu0 %vm39_vm0, %v23_v18 }
  0x41   :  { %262 = vmatmul.mubr.msk.f32.vlgmr.msra.gmra.mxu0 %vm39_vm0, %v22_v19 }
  0x7e   :  { %v168_v22 = vpop.permute.xlu0 %167 }
 0x101   :  { %v157_v21 = vpop.f32.mrf.mxu0 }
 0x102   :  { %v163_v23 = vmul.f32 %v162_v20, %v157_v21 }
 0x103   :  { %v263_v24 = vpop.f32.mrf.mxu0 }
 0x104   :  { %v170_v26 = vmul.f32 %v168_v22, %v163_v23 }
 0x106   :  { %v178_v27 = vmul.f32 %v211_v25, %v170_v26 }
 0x108   :  { %179 = vst [vmem:[#allocation3] sm:$0xff] %v178_v27 }
 0x109   :  { %280 = shalt.err (!%p277_p4)
}
 0x10a   :  { %189 = dma.vmem_to_hbm [thread:$0]  %s187_s6, 128, %s410_s5, [#allocation4]  }
 0x10b   :  { %289 = dma.done.wait [#allocation4], 128  }
 0x10c   :  { %290 = vsyncadd [#allocation4], 4294967168 }
 0x10d   :  { %193 = vsyncpa [#allocation4], 1 }

</bundles_post_ra>
